<compile_context>
chip_gen: v5e
topology: v5e:2x2
jax: 0.10.0
libtpu: 0.0.40
codegen_flags: <defaults>
</compile_context>

<pallas_src>
import math

import jax
import jax.numpy as jnp
import numpy as np
from jax.experimental import pallas as pl
from jax.experimental.pallas import tpu as pltpu

# ----------------------- problem sizes (small, synthetic) -----------------------
B = 2            # batch
S = 8            # sequence length
D_MODEL = 32     # d_model
NHEAD = 4        # nhead
HEAD_DIM = D_MODEL // NHEAD
DIM_FF = 64      # dim_feedforward


def _num_batch_blocks(batch: int) -> int:
    """Grid length over batch: 1 step on single-TC chips (v5e/v6e), 2 on v7x."""
    try:
        kind = jax.devices()[0].device_kind.lower()
        n_tc = 2 if ("v7" in kind or "7x" in kind) else 1
    except Exception:
        n_tc = 1
    g = max(1, min(batch, n_tc))
    while batch % g:
        g -= 1
    return g


# --------------------------------- Pallas kernel --------------------------------
def _make_kernel(bb: int):
    scale = 1.0 / math.sqrt(HEAD_DIM)

    def kernel(x_ref, wqkv_ref, bqkv_ref, wo_ref, bo_ref, wf_ref, bf_ref, out_ref):
        # x_ref block: (bb, S, D); all weights are whole (tiny) arrays in VMEM.
        wqkv = wqkv_ref[...]        # (H, D, 3*hd) head-major fused QKV weights
        bqkv = bqkv_ref[...]        # (H, 1, 3*hd)
        bo = bo_ref[...]            # (1, D)
        wf = wf_ref[...]            # (D, F)
        bf = bf_ref[...]            # (1, F)

        for b in range(bb):         # static unroll over batch elements in this block
            x = x_ref[b].astype(jnp.float32)                    # (S, D)
            xh = jnp.broadcast_to(x, (NHEAD, S, D_MODEL))       # (H, S, D), leading batch

            # Fused QKV projection, head-major: one batched MXU einsum.
            qkv = jnp.einsum('hsd,hdf->hsf', xh, wqkv,
                             preferred_element_type=jnp.float32) + bqkv   # (H, S, 3*hd)
            q = qkv[:, :, :HEAD_DIM]
            k = qkv[:, :, HEAD_DIM:2 * HEAD_DIM]
            v = qkv[:, :, 2 * HEAD_DIM:]

            # Scaled dot-product attention, batched over heads (leading axis).
            s = jnp.einsum('hqd,hkd->hqk', q, k,
                           preferred_element_type=jnp.float32) * scale    # (H, S, S)
            s_max = jnp.max(s, axis=-1, keepdims=True)
            e = jnp.exp(s - s_max)
            # Exact softmax normalization (approx reciprocal failed the accuracy check).
            p = e / jnp.sum(e, axis=-1, keepdims=True)
            o = jnp.einsum('hqk,hkd->hqd', p, v,
                           preferred_element_type=jnp.float32)            # (H, S, hd)

            # Output projection without any concat: accumulate per-head matmuls.
            attn = jnp.zeros((S, D_MODEL), jnp.float32)
            for h in range(NHEAD):
                attn = attn + jnp.dot(o[h], wo_ref[h],
                                      preferred_element_type=jnp.float32)
            attn = attn + bo

            # Feed-forward + ReLU.
            ff = jnp.dot(attn, wf, preferred_element_type=jnp.float32) + bf
            out_ref[b] = jnp.maximum(ff, 0.0).astype(out_ref.dtype)

    return kernel


# ------------------------------------ wrapper ------------------------------------
def transformer_decoder_layer(x, params):
    (wq, wk, wv, bq, bk, bv, wo, bo, wf, bf) = params
    Bx, Sx, Dx = x.shape
    H, hd, F = NHEAD, HEAD_DIM, DIM_FF

    # ---- host-side weight re-packing (plain XLA reshapes/concats, one-time) ----
    def head_major(w):                        # (D, D) -> (H, D, hd)
        return w.reshape(Dx, H, hd).transpose(1, 0, 2)

    wqkv = jnp.concatenate(
        [head_major(wq), head_major(wk), head_major(wv)], axis=-1)     # (H, D, 3*hd)
    bqkv = jnp.concatenate(
        [bq.reshape(H, 1, hd), bk.reshape(H, 1, hd), bv.reshape(H, 1, hd)],
        axis=-1)                                                       # (H, 1, 3*hd)
    wo_h = wo.reshape(H, hd, Dx)                                       # (H, hd, D)

    g = _num_batch_blocks(Bx)     # grid steps over batch
    bb = Bx // g                  # batch elements handled per grid step

    whole2 = lambda i: (0, 0)
    whole3 = lambda i: (0, 0, 0)

    return pl.pallas_call(
        _make_kernel(bb),
        out_shape=jax.ShapeDtypeStruct((Bx, Sx, F), jnp.float32),
        grid_spec=pltpu.PrefetchScalarGridSpec(
            num_scalar_prefetch=0,
            grid=(g,),
            in_specs=[
                pl.BlockSpec((bb, Sx, Dx), lambda i: (i, 0, 0)),       # x
                pl.BlockSpec((H, Dx, 3 * hd), whole3),                 # fused QKV weight
                pl.BlockSpec((H, 1, 3 * hd), whole3),                  # fused QKV bias
                pl.BlockSpec((H, hd, Dx), whole3),                     # wo (head-major)
                pl.BlockSpec((1, Dx), whole2),                         # bo
                pl.BlockSpec((Dx, F), whole2),                         # wf
                pl.BlockSpec((1, F), whole2),                          # bf
            ],
            out_specs=pl.BlockSpec((bb, Sx, F), lambda i: (i, 0, 0)),
        ),
        compiler_params=pltpu.CompilerParams(
            dimension_semantics=("parallel",)),
    )(x, wqkv, bqkv, wo_h, bo, wf, bf)


# ------------------------------ pure-JAX reference -------------------------------
def reference(x, params):
    (wq, wk, wv, bq, bk, bv, wo, bo, wf, bf) = params
    q = x @ wq + bq
    k = x @ wk + bk
    v = x @ wv + bv

    def split_heads(t):  # (B, S, D) -> (B, H, S, hd)
        return t.reshape(B, S, NHEAD, HEAD_DIM).transpose(0, 2, 1, 3)

    qh, kh, vh = split_heads(q), split_heads(k), split_heads(v)
    s = jnp.einsum('bhqd,bhkd->bhqk', qh, kh) / math.sqrt(HEAD_DIM)
    p = jax.nn.softmax(s, axis=-1)
    o = jnp.einsum('bhqk,bhkd->bhqd', p, vh)
    o = o.transpose(0, 2, 1, 3).reshape(B, S, D_MODEL)
    o = o @ wo + bo
    return jax.nn.relu(o @ wf + bf)


# -------------------------------------- main --------------------------------------
if __name__ == "__main__":
    key = jax.random.PRNGKey(0)
    keys = jax.random.split(key, 12)

    scale = 1.0 / math.sqrt(D_MODEL)
    x = jax.random.normal(keys[0], (B, S, D_MODEL), dtype=jnp.float32)

    wq = jax.random.normal(keys[1], (D_MODEL, D_MODEL), jnp.float32) * scale
    wk = jax.random.normal(keys[2], (D_MODEL, D_MODEL), jnp.float32) * scale
    wv = jax.random.normal(keys[3], (D_MODEL, D_MODEL), jnp.float32) * scale
    bq = jax.random.normal(keys[4], (1, D_MODEL), jnp.float32) * 0.01
    bk = jax.random.normal(keys[5], (1, D_MODEL), jnp.float32) * 0.01
    bv = jax.random.normal(keys[6], (1, D_MODEL), jnp.float32) * 0.01
    wo = jax.random.normal(keys[7], (D_MODEL, D_MODEL), jnp.float32) * scale
    bo = jax.random.normal(keys[8], (1, D_MODEL), jnp.float32) * 0.01
    wf = jax.random.normal(keys[9], (D_MODEL, DIM_FF), jnp.float32) * scale
    bf = jax.random.normal(keys[10], (1, DIM_FF), jnp.float32) * 0.01

    params = (wq, wk, wv, bq, bk, bv, wo, bo, wf, bf)

    out = transformer_decoder_layer(x, params)
    out = jax.block_until_ready(out)

    ref = reference(x, params)
    np.testing.assert_allclose(np.asarray(out), np.asarray(ref),
                               rtol=2e-3, atol=2e-3)
    print("KERNEL_OK")
</pallas_src>

<mosaic_0001>
module attributes {stable_mosaic.version = 11 : i64} {
  func.func @kernel(%arg0: i32, %arg1: memref<2x8x32xf32, #tpu.memory_space<vmem>>, %arg2: memref<4x32x24xf32, #tpu.memory_space<vmem>>, %arg3: memref<4x1x24xf32, #tpu.memory_space<vmem>>, %arg4: memref<4x8x32xf32, #tpu.memory_space<vmem>>, %arg5: memref<1x32xf32, #tpu.memory_space<vmem>>, %arg6: memref<32x64xf32, #tpu.memory_space<vmem>>, %arg7: memref<1x64xf32, #tpu.memory_space<vmem>>, %arg8: memref<2x8x64xf32, #tpu.memory_space<vmem>>) attributes {dimension_semantics = [#tpu.dimension_semantics<parallel>], iteration_bounds = array<i64: 1>, scalar_prefetch = 0 : i64, scratch_operands = 0 : i64, tpu.core_type = #tpu.core_type<tc>, window_params = [{transform_indices = @transform_0, window_bounds = array<i64: 2, 8, 32>}, {pipeline_mode = #tpu.pipeline_mode<synchronous>, transform_indices = @transform_1, window_bounds = array<i64: 4, 32, 24>}, {pipeline_mode = #tpu.pipeline_mode<synchronous>, transform_indices = @transform_2, window_bounds = array<i64: 4, 1, 24>}, {pipeline_mode = #tpu.pipeline_mode<synchronous>, transform_indices = @transform_3, window_bounds = array<i64: 4, 8, 32>}, {pipeline_mode = #tpu.pipeline_mode<synchronous>, transform_indices = @transform_4, window_bounds = array<i64: 1, 32>}, {pipeline_mode = #tpu.pipeline_mode<synchronous>, transform_indices = @transform_5, window_bounds = array<i64: 32, 64>}, {pipeline_mode = #tpu.pipeline_mode<synchronous>, transform_indices = @transform_6, window_bounds = array<i64: 1, 64>}, {transform_indices = @transform_7, window_bounds = array<i64: 2, 8, 64>}]} {
    %c0 = arith.constant 0 : index
    %c0_0 = arith.constant 0 : index
    %c0_1 = arith.constant 0 : index
    %0 = vector.load %arg2[%c0, %c0_0, %c0_1] : memref<4x32x24xf32, #tpu.memory_space<vmem>>, vector<4x32x24xf32>
    %c0_2 = arith.constant 0 : index
    %c0_3 = arith.constant 0 : index
    %c0_4 = arith.constant 0 : index
    %1 = vector.load %arg3[%c0_2, %c0_3, %c0_4] : memref<4x1x24xf32, #tpu.memory_space<vmem>>, vector<4x1x24xf32>
    %c0_5 = arith.constant 0 : index
    %c0_6 = arith.constant 0 : index
    %2 = vector.load %arg5[%c0_5, %c0_6] : memref<1x32xf32, #tpu.memory_space<vmem>>, vector<1x32xf32>
    %c0_7 = arith.constant 0 : index
    %c0_8 = arith.constant 0 : index
    %3 = vector.load %arg6[%c0_7, %c0_8] : memref<32x64xf32, #tpu.memory_space<vmem>>, vector<32x64xf32>
    %c0_9 = arith.constant 0 : index
    %c0_10 = arith.constant 0 : index
    %4 = vector.load %arg7[%c0_9, %c0_10] : memref<1x64xf32, #tpu.memory_space<vmem>>, vector<1x64xf32>
    %c0_11 = arith.constant 0 : index
    %c0_12 = arith.constant 0 : index
    %c0_13 = arith.constant 0 : index
    %5 = vector.load %arg1[%c0_11, %c0_12, %c0_13] : memref<2x8x32xf32, #tpu.memory_space<vmem>>, vector<1x8x32xf32>
    %6 = vector.shape_cast %5 : vector<1x8x32xf32> to vector<8x32xf32>
    %7 = vector.shape_cast %6 : vector<8x32xf32> to vector<1x8x32xf32>
    %8 = vector.broadcast %7 : vector<1x8x32xf32> to vector<4x8x32xf32>
    "tpu.trace_start"() <{level = 10 : i32, message = "hsd,hdf->hsf"}> : () -> ()
    %cst = arith.constant dense<0.000000e+00> : vector<4x8x24xf32>
    %9 = tpu.matmul %8, %0, %cst {dimension_numbers = #tpu.dot_dimension_numbers<[2], [1], [1], [2], [0, 0, 0, 1, 1, 2], [0], [0]>} : vector<4x8x32xf32>, vector<4x32x24xf32>, vector<4x8x24xf32> -> vector<4x8x24xf32>
    "tpu.trace_stop"() : () -> ()
    %10 = vector.broadcast %1 : vector<4x1x24xf32> to vector<4x8x24xf32>
    %11 = arith.addf %9, %10 : vector<4x8x24xf32>
    %12 = vector.extract_strided_slice %11 {offsets = [0, 0, 0], sizes = [4, 8, 8], strides = [1, 1, 1]} : vector<4x8x24xf32> to vector<4x8x8xf32>
    %13 = vector.extract_strided_slice %11 {offsets = [0, 0, 8], sizes = [4, 8, 8], strides = [1, 1, 1]} : vector<4x8x24xf32> to vector<4x8x8xf32>
    %14 = vector.extract_strided_slice %11 {offsets = [0, 0, 16], sizes = [4, 8, 8], strides = [1, 1, 1]} : vector<4x8x24xf32> to vector<4x8x8xf32>
    "tpu.trace_start"() <{level = 10 : i32, message = "hqd,hkd->hqk"}> : () -> ()
    %cst_14 = arith.constant dense<0.000000e+00> : vector<4x8x8xf32>
    %15 = tpu.matmul %12, %13, %cst_14 {dimension_numbers = #tpu.dot_dimension_numbers<[2], [2], [1], [1], [0, 0, 0, 1, 1, 1], [0], [0]>} : vector<4x8x8xf32>, vector<4x8x8xf32>, vector<4x8x8xf32> -> vector<4x8x8xf32>
    "tpu.trace_stop"() : () -> ()
    %cst_15 = arith.constant 0.353553385 : f32
    %16 = vector.broadcast %cst_15 : f32 to vector<4x8x8xf32>
    %17 = arith.mulf %15, %16 : vector<4x8x8xf32>
    %cst_16 = arith.constant dense<0xFF800000> : vector<4x8xf32>
    %18 = vector.multi_reduction <maximumf>, %17, %cst_16 [2] : vector<4x8x8xf32> to vector<4x8xf32>
    %19 = vector.shape_cast %18 : vector<4x8xf32> to vector<4x8x1xf32>
    %20 = vector.broadcast %19 : vector<4x8x1xf32> to vector<4x8x8xf32>
    %21 = arith.subf %17, %20 : vector<4x8x8xf32>
    %22 = math.exp %21 : vector<4x8x8xf32>
    %cst_17 = arith.constant dense<0.000000e+00> : vector<4x8xf32>
    %23 = vector.multi_reduction <add>, %22, %cst_17 [2] : vector<4x8x8xf32> to vector<4x8xf32>
    %24 = vector.shape_cast %23 : vector<4x8xf32> to vector<4x8x1xf32>
    %25 = vector.broadcast %24 : vector<4x8x1xf32> to vector<4x8x8xf32>
    %26 = arith.divf %22, %25 : vector<4x8x8xf32>
    "tpu.trace_start"() <{level = 10 : i32, message = "hqk,hkd->hqd"}> : () -> ()
    %cst_18 = arith.constant dense<0.000000e+00> : vector<4x8x8xf32>
    %27 = tpu.matmul %26, %14, %cst_18 {dimension_numbers = #tpu.dot_dimension_numbers<[2], [1], [1], [2], [0, 0, 0, 1, 1, 2], [0], [0]>} : vector<4x8x8xf32>, vector<4x8x8xf32>, vector<4x8x8xf32> -> vector<4x8x8xf32>
    %cst_19 = arith.constant 0.000000e+00 : f32
    "tpu.trace_stop"() : () -> ()
    %28 = vector.broadcast %cst_19 : f32 to vector<8x32xf32>
    %29 = vector.extract_strided_slice %27 {offsets = [0, 0, 0], sizes = [1, 8, 8], strides = [1, 1, 1]} : vector<4x8x8xf32> to vector<1x8x8xf32>
    %30 = vector.shape_cast %29 : vector<1x8x8xf32> to vector<8x8xf32>
    %c0_20 = arith.constant 0 : index
    %c0_21 = arith.constant 0 : index
    %c0_22 = arith.constant 0 : index
    %31 = vector.load %arg4[%c0_20, %c0_21, %c0_22] : memref<4x8x32xf32, #tpu.memory_space<vmem>>, vector<1x8x32xf32>
    %32 = vector.shape_cast %31 : vector<1x8x32xf32> to vector<8x32xf32>
    %cst_23 = arith.constant dense<0.000000e+00> : vector<8x32xf32>
    %33 = tpu.matmul %30, %32, %cst_23 {dimension_numbers = #tpu.dot_dimension_numbers<[1], [0], [0], [1], [0, 0, 1, 1], [], []>} : vector<8x8xf32>, vector<8x32xf32>, vector<8x32xf32> -> vector<8x32xf32>
    %34 = arith.addf %28, %33 : vector<8x32xf32>
    %35 = vector.extract_strided_slice %27 {offsets = [1, 0, 0], sizes = [1, 8, 8], strides = [1, 1, 1]} : vector<4x8x8xf32> to vector<1x8x8xf32>
    %36 = vector.shape_cast %35 : vector<1x8x8xf32> to vector<8x8xf32>
    %c1 = arith.constant 1 : index
    %c0_24 = arith.constant 0 : index
    %c0_25 = arith.constant 0 : index
    %37 = vector.load %arg4[%c1, %c0_24, %c0_25] : memref<4x8x32xf32, #tpu.memory_space<vmem>>, vector<1x8x32xf32>
    %38 = vector.shape_cast %37 : vector<1x8x32xf32> to vector<8x32xf32>
    %cst_26 = arith.constant dense<0.000000e+00> : vector<8x32xf32>
    %39 = tpu.matmul %36, %38, %cst_26 {dimension_numbers = #tpu.dot_dimension_numbers<[1], [0], [0], [1], [0, 0, 1, 1], [], []>} : vector<8x8xf32>, vector<8x32xf32>, vector<8x32xf32> -> vector<8x32xf32>
    %40 = arith.addf %34, %39 : vector<8x32xf32>
    %41 = vector.extract_strided_slice %27 {offsets = [2, 0, 0], sizes = [1, 8, 8], strides = [1, 1, 1]} : vector<4x8x8xf32> to vector<1x8x8xf32>
    %42 = vector.shape_cast %41 : vector<1x8x8xf32> to vector<8x8xf32>
    %c2 = arith.constant 2 : index
    %c0_27 = arith.constant 0 : index
    %c0_28 = arith.constant 0 : index
    %43 = vector.load %arg4[%c2, %c0_27, %c0_28] : memref<4x8x32xf32, #tpu.memory_space<vmem>>, vector<1x8x32xf32>
    %44 = vector.shape_cast %43 : vector<1x8x32xf32> to vector<8x32xf32>
    %cst_29 = arith.constant dense<0.000000e+00> : vector<8x32xf32>
    %45 = tpu.matmul %42, %44, %cst_29 {dimension_numbers = #tpu.dot_dimension_numbers<[1], [0], [0], [1], [0, 0, 1, 1], [], []>} : vector<8x8xf32>, vector<8x32xf32>, vector<8x32xf32> -> vector<8x32xf32>
    %46 = arith.addf %40, %45 : vector<8x32xf32>
    %47 = vector.extract_strided_slice %27 {offsets = [3, 0, 0], sizes = [1, 8, 8], strides = [1, 1, 1]} : vector<4x8x8xf32> to vector<1x8x8xf32>
    %48 = vector.shape_cast %47 : vector<1x8x8xf32> to vector<8x8xf32>
    %c3 = arith.constant 3 : index
    %c0_30 = arith.constant 0 : index
    %c0_31 = arith.constant 0 : index
    %49 = vector.load %arg4[%c3, %c0_30, %c0_31] : memref<4x8x32xf32, #tpu.memory_space<vmem>>, vector<1x8x32xf32>
    %50 = vector.shape_cast %49 : vector<1x8x32xf32> to vector<8x32xf32>
    %cst_32 = arith.constant dense<0.000000e+00> : vector<8x32xf32>
    %51 = tpu.matmul %48, %50, %cst_32 {dimension_numbers = #tpu.dot_dimension_numbers<[1], [0], [0], [1], [0, 0, 1, 1], [], []>} : vector<8x8xf32>, vector<8x32xf32>, vector<8x32xf32> -> vector<8x32xf32>
    %52 = arith.addf %46, %51 : vector<8x32xf32>
    %53 = vector.broadcast %2 : vector<1x32xf32> to vector<8x32xf32>
    %54 = arith.addf %52, %53 : vector<8x32xf32>
    %cst_33 = arith.constant dense<0.000000e+00> : vector<8x64xf32>
    %55 = tpu.matmul %54, %3, %cst_33 {dimension_numbers = #tpu.dot_dimension_numbers<[1], [0], [0], [1], [0, 0, 1, 1], [], []>} : vector<8x32xf32>, vector<32x64xf32>, vector<8x64xf32> -> vector<8x64xf32>
    %56 = vector.broadcast %4 : vector<1x64xf32> to vector<8x64xf32>
    %57 = arith.addf %55, %56 : vector<8x64xf32>
    %cst_34 = arith.constant 0.000000e+00 : f32
    %58 = vector.broadcast %cst_34 : f32 to vector<8x64xf32>
    %59 = arith.maximumf %57, %58 : vector<8x64xf32>
    %c0_35 = arith.constant 0 : index
    %c0_36 = arith.constant 0 : index
    %c0_37 = arith.constant 0 : index
    %60 = vector.load %arg8[%c0_35, %c0_36, %c0_37] : memref<2x8x64xf32, #tpu.memory_space<vmem>>, vector<1x8x64xf32>
    %61 = vector.shape_cast %60 : vector<1x8x64xf32> to vector<8x64xf32>
    %62 = vector.shape_cast %59 : vector<8x64xf32> to vector<1x8x64xf32>
    tpu.vector_store %arg8[%c0_35, %c0_36, %c0_37], %62 {strides = array<i32>} : memref<2x8x64xf32, #tpu.memory_space<vmem>>, vector<1x8x64xf32>,
    %c1_38 = arith.constant 1 : index
    %c0_39 = arith.constant 0 : index
    %c0_40 = arith.constant 0 : index
    %63 = vector.load %arg1[%c1_38, %c0_39, %c0_40] : memref<2x8x32xf32, #tpu.memory_space<vmem>>, vector<1x8x32xf32>
    %64 = vector.shape_cast %63 : vector<1x8x32xf32> to vector<8x32xf32>
    %65 = vector.shape_cast %64 : vector<8x32xf32> to vector<1x8x32xf32>
    %66 = vector.broadcast %65 : vector<1x8x32xf32> to vector<4x8x32xf32>
    "tpu.trace_start"() <{level = 10 : i32, message = "hsd,hdf->hsf"}> : () -> ()
    %cst_41 = arith.constant dense<0.000000e+00> : vector<4x8x24xf32>
    %67 = tpu.matmul %66, %0, %cst_41 {dimension_numbers = #tpu.dot_dimension_numbers<[2], [1], [1], [2], [0, 0, 0, 1, 1, 2], [0], [0]>} : vector<4x8x32xf32>, vector<4x32x24xf32>, vector<4x8x24xf32> -> vector<4x8x24xf32>
    "tpu.trace_stop"() : () -> ()
    %68 = vector.broadcast %1 : vector<4x1x24xf32> to vector<4x8x24xf32>
    %69 = arith.addf %67, %68 : vector<4x8x24xf32>
    %70 = vector.extract_strided_slice %69 {offsets = [0, 0, 0], sizes = [4, 8, 8], strides = [1, 1, 1]} : vector<4x8x24xf32> to vector<4x8x8xf32>
    %71 = vector.extract_strided_slice %69 {offsets = [0, 0, 8], sizes = [4, 8, 8], strides = [1, 1, 1]} : vector<4x8x24xf32> to vector<4x8x8xf32>
    %72 = vector.extract_strided_slice %69 {offsets = [0, 0, 16], sizes = [4, 8, 8], strides = [1, 1, 1]} : vector<4x8x24xf32> to vector<4x8x8xf32>
    "tpu.trace_start"() <{level = 10 : i32, message = "hqd,hkd->hqk"}> : () -> ()
    %cst_42 = arith.constant dense<0.000000e+00> : vector<4x8x8xf32>
    %73 = tpu.matmul %70, %71, %cst_42 {dimension_numbers = #tpu.dot_dimension_numbers<[2], [2], [1], [1], [0, 0, 0, 1, 1, 1], [0], [0]>} : vector<4x8x8xf32>, vector<4x8x8xf32>, vector<4x8x8xf32> -> vector<4x8x8xf32>
    "tpu.trace_stop"() : () -> ()
    %cst_43 = arith.constant 0.353553385 : f32
    %74 = vector.broadcast %cst_43 : f32 to vector<4x8x8xf32>
    %75 = arith.mulf %73, %74 : vector<4x8x8xf32>
    %cst_44 = arith.constant dense<0xFF800000> : vector<4x8xf32>
    %76 = vector.multi_reduction <maximumf>, %75, %cst_44 [2] : vector<4x8x8xf32> to vector<4x8xf32>
    %77 = vector.shape_cast %76 : vector<4x8xf32> to vector<4x8x1xf32>
    %78 = vector.broadcast %77 : vector<4x8x1xf32> to vector<4x8x8xf32>
    %79 = arith.subf %75, %78 : vector<4x8x8xf32>
    %80 = math.exp %79 : vector<4x8x8xf32>
    %cst_45 = arith.constant dense<0.000000e+00> : vector<4x8xf32>
    %81 = vector.multi_reduction <add>, %80, %cst_45 [2] : vector<4x8x8xf32> to vector<4x8xf32>
    %82 = vector.shape_cast %81 : vector<4x8xf32> to vector<4x8x1xf32>
    %83 = vector.broadcast %82 : vector<4x8x1xf32> to vector<4x8x8xf32>
    %84 = arith.divf %80, %83 : vector<4x8x8xf32>
    "tpu.trace_start"() <{level = 10 : i32, message = "hqk,hkd->hqd"}> : () -> ()
    %cst_46 = arith.constant dense<0.000000e+00> : vector<4x8x8xf32>
    %85 = tpu.matmul %84, %72, %cst_46 {dimension_numbers = #tpu.dot_dimension_numbers<[2], [1], [1], [2], [0, 0, 0, 1, 1, 2], [0], [0]>} : vector<4x8x8xf32>, vector<4x8x8xf32>, vector<4x8x8xf32> -> vector<4x8x8xf32>
    %cst_47 = arith.constant 0.000000e+00 : f32
    "tpu.trace_stop"() : () -> ()
    %86 = vector.broadcast %cst_47 : f32 to vector<8x32xf32>
    %87 = vector.extract_strided_slice %85 {offsets = [0, 0, 0], sizes = [1, 8, 8], strides = [1, 1, 1]} : vector<4x8x8xf32> to vector<1x8x8xf32>
    %88 = vector.shape_cast %87 : vector<1x8x8xf32> to vector<8x8xf32>
    %c0_48 = arith.constant 0 : index
    %c0_49 = arith.constant 0 : index
    %c0_50 = arith.constant 0 : index
    %89 = vector.load %arg4[%c0_48, %c0_49, %c0_50] : memref<4x8x32xf32, #tpu.memory_space<vmem>>, vector<1x8x32xf32>
    %90 = vector.shape_cast %89 : vector<1x8x32xf32> to vector<8x32xf32>
    %cst_51 = arith.constant dense<0.000000e+00> : vector<8x32xf32>
    %91 = tpu.matmul %88, %90, %cst_51 {dimension_numbers = #tpu.dot_dimension_numbers<[1], [0], [0], [1], [0, 0, 1, 1], [], []>} : vector<8x8xf32>, vector<8x32xf32>, vector<8x32xf32> -> vector<8x32xf32>
    %92 = arith.addf %86, %91 : vector<8x32xf32>
    %93 = vector.extract_strided_slice %85 {offsets = [1, 0, 0], sizes = [1, 8, 8], strides = [1, 1, 1]} : vector<4x8x8xf32> to vector<1x8x8xf32>
    %94 = vector.shape_cast %93 : vector<1x8x8xf32> to vector<8x8xf32>
    %c1_52 = arith.constant 1 : index
    %c0_53 = arith.constant 0 : index
    %c0_54 = arith.constant 0 : index
    %95 = vector.load %arg4[%c1_52, %c0_53, %c0_54] : memref<4x8x32xf32, #tpu.memory_space<vmem>>, vector<1x8x32xf32>
    %96 = vector.shape_cast %95 : vector<1x8x32xf32> to vector<8x32xf32>
    %cst_55 = arith.constant dense<0.000000e+00> : vector<8x32xf32>
    %97 = tpu.matmul %94, %96, %cst_55 {dimension_numbers = #tpu.dot_dimension_numbers<[1], [0], [0], [1], [0, 0, 1, 1], [], []>} : vector<8x8xf32>, vector<8x32xf32>, vector<8x32xf32> -> vector<8x32xf32>
    %98 = arith.addf %92, %97 : vector<8x32xf32>
    %99 = vector.extract_strided_slice %85 {offsets = [2, 0, 0], sizes = [1, 8, 8], strides = [1, 1, 1]} : vector<4x8x8xf32> to vector<1x8x8xf32>
    %100 = vector.shape_cast %99 : vector<1x8x8xf32> to vector<8x8xf32>
    %c2_56 = arith.constant 2 : index
    %c0_57 = arith.constant 0 : index
    %c0_58 = arith.constant 0 : index
    %101 = vector.load %arg4[%c2_56, %c0_57, %c0_58] : memref<4x8x32xf32, #tpu.memory_space<vmem>>, vector<1x8x32xf32>
    %102 = vector.shape_cast %101 : vector<1x8x32xf32> to vector<8x32xf32>
    %cst_59 = arith.constant dense<0.000000e+00> : vector<8x32xf32>
    %103 = tpu.matmul %100, %102, %cst_59 {dimension_numbers = #tpu.dot_dimension_numbers<[1], [0], [0], [1], [0, 0, 1, 1], [], []>} : vector<8x8xf32>, vector<8x32xf32>, vector<8x32xf32> -> vector<8x32xf32>
    %104 = arith.addf %98, %103 : vector<8x32xf32>
    %105 = vector.extract_strided_slice %85 {offsets = [3, 0, 0], sizes = [1, 8, 8], strides = [1, 1, 1]} : vector<4x8x8xf32> to vector<1x8x8xf32>
    %106 = vector.shape_cast %105 : vector<1x8x8xf32> to vector<8x8xf32>
    %c3_60 = arith.constant 3 : index
    %c0_61 = arith.constant 0 : index
    %c0_62 = arith.constant 0 : index
    %107 = vector.load %arg4[%c3_60, %c0_61, %c0_62] : memref<4x8x32xf32, #tpu.memory_space<vmem>>, vector<1x8x32xf32>
    %108 = vector.shape_cast %107 : vector<1x8x32xf32> to vector<8x32xf32>
    %cst_63 = arith.constant dense<0.000000e+00> : vector<8x32xf32>
    %109 = tpu.matmul %106, %108, %cst_63 {dimension_numbers = #tpu.dot_dimension_numbers<[1], [0], [0], [1], [0, 0, 1, 1], [], []>} : vector<8x8xf32>, vector<8x32xf32>, vector<8x32xf32> -> vector<8x32xf32>
    %110 = arith.addf %104, %109 : vector<8x32xf32>
    %111 = vector.broadcast %2 : vector<1x32xf32> to vector<8x32xf32>
    %112 = arith.addf %110, %111 : vector<8x32xf32>
    %cst_64 = arith.constant dense<0.000000e+00> : vector<8x64xf32>
    %113 = tpu.matmul %112, %3, %cst_64 {dimension_numbers = #tpu.dot_dimension_numbers<[1], [0], [0], [1], [0, 0, 1, 1], [], []>} : vector<8x32xf32>, vector<32x64xf32>, vector<8x64xf32> -> vector<8x64xf32>
    %114 = vector.broadcast %4 : vector<1x64xf32> to vector<8x64xf32>
    %115 = arith.addf %113, %114 : vector<8x64xf32>
    %cst_65 = arith.constant 0.000000e+00 : f32
    %116 = vector.broadcast %cst_65 : f32 to vector<8x64xf32>
    %117 = arith.maximumf %115, %116 : vector<8x64xf32>
    %c1_66 = arith.constant 1 : index
    %c0_67 = arith.constant 0 : index
    %c0_68 = arith.constant 0 : index
    %118 = vector.load %arg8[%c1_66, %c0_67, %c0_68] : memref<2x8x64xf32, #tpu.memory_space<vmem>>, vector<1x8x64xf32>
    %119 = vector.shape_cast %118 : vector<1x8x64xf32> to vector<8x64xf32>
    %120 = vector.shape_cast %117 : vector<8x64xf32> to vector<1x8x64xf32>
    tpu.vector_store %arg8[%c1_66, %c0_67, %c0_68], %120 {strides = array<i32>} : memref<2x8x64xf32, #tpu.memory_space<vmem>>, vector<1x8x64xf32>,
    return
  }
  func.func @transform_0(%arg0: i32) -> (i32, i32, i32) {
    %c0_i32 = arith.constant 0 : i32
    %c0_i32_0 = arith.constant 0 : i32
    %c0_i32_1 = arith.constant 0 : i32
    return %arg0, %c0_i32, %c0_i32_0 : i32, i32, i32
  }
  func.func @transform_1(%arg0: i32) -> (i32, i32, i32) {
    %c0_i32 = arith.constant 0 : i32
    %c0_i32_0 = arith.constant 0 : i32
    %c0_i32_1 = arith.constant 0 : i32
    %c0_i32_2 = arith.constant 0 : i32
    return %c0_i32, %c0_i32_0, %c0_i32_1 : i32, i32, i32
  }
  func.func @transform_2(%arg0: i32) -> (i32, i32, i32) {
    %c0_i32 = arith.constant 0 : i32
    %c0_i32_0 = arith.constant 0 : i32
    %c0_i32_1 = arith.constant 0 : i32
    %c0_i32_2 = arith.constant 0 : i32
    return %c0_i32, %c0_i32_0, %c0_i32_1 : i32, i32, i32
  }
  func.func @transform_3(%arg0: i32) -> (i32, i32, i32) {
    %c0_i32 = arith.constant 0 : i32
    %c0_i32_0 = arith.constant 0 : i32
    %c0_i32_1 = arith.constant 0 : i32
    %c0_i32_2 = arith.constant 0 : i32
    return %c0_i32, %c0_i32_0, %c0_i32_1 : i32, i32, i32
  }
  func.func @transform_4(%arg0: i32) -> (i32, i32) {
    %c0_i32 = arith.constant 0 : i32
    %c0_i32_0 = arith.constant 0 : i32
    %c0_i32_1 = arith.constant 0 : i32
    return %c0_i32, %c0_i32_0 : i32, i32
  }
  func.func @transform_5(%arg0: i32) -> (i32, i32) {
    %c0_i32 = arith.constant 0 : i32
    %c0_i32_0 = arith.constant 0 : i32
    %c0_i32_1 = arith.constant 0 : i32
    return %c0_i32, %c0_i32_0 : i32, i32
  }
  func.func @transform_6(%arg0: i32) -> (i32, i32) {
    %c0_i32 = arith.constant 0 : i32
    %c0_i32_0 = arith.constant 0 : i32
    %c0_i32_1 = arith.constant 0 : i32
    return %c0_i32, %c0_i32_0 : i32, i32
  }
  func.func @transform_7(%arg0: i32) -> (i32, i32, i32) {
    %c0_i32 = arith.constant 0 : i32
    %c0_i32_0 = arith.constant 0 : i32
    %c0_i32_1 = arith.constant 0 : i32
    return %arg0, %c0_i32, %c0_i32_0 : i32, i32, i32
  }
}

</mosaic_0001>

<bundles_post_ra>
// kernel: tpu_custom_call.1
= control target key start
LH: loop header
LB: loop body
LE: loop exit
PB: predicated region body
PF: predicated region fallthrough
CT: control target
= control target key end

     0   :  { %vm66_vm0 = vcmask 261120   ;;  %s1648_s0 = inlined_call_operand.vmem [shape: f32[2,8,32], index: 0, kind: input, shape index: {}]   ;;  %s1649_s1 = inlined_call_operand.vmem [shape: f32[4,32,24], index: 1, kind: input, shape index: {}]   ;;  %s1650_s2 = inlined_call_operand.vmem [shape: f32[4,1,24], index: 2, kind: input, shape index: {}]   ;;  %s1651_s3 = inlined_call_operand.vmem [shape: f32[4,8,32], index: 3, kind: input, shape index: {}]   ;;  %s1652_s4 = inlined_call_operand.vmem [shape: f32[1,32], index: 4, kind: input, shape index: {}]   ;;  %s1653_s5 = inlined_call_operand.vmem [shape: f32[32,64], index: 5, kind: input, shape index: {}]   ;;  %s1654_s6 = inlined_call_operand.vmem [shape: f32[1,64], index: 6, kind: input, shape index: {}]   ;;  %s1655_s7 = inlined_call_operand.hbm [shape: f32[2,8,64], index: 7, kind: output, shape index: {}]  }
   0x1   :  { %v1318_v0 = vld [vmem:[%s1649_s1 + $0x18] sm:$0xff]  ;;  %v1335_v3 = vld [vmem:[%s1649_s1 + $0x10] sm:$0xff]  ;;  %v1351_v6 = vld [vmem:[%s1649_s1 + $0x8] sm:$0xff] }
   0x2   :  { %v1323_v1 = vld [vmem:[%s1649_s1 + $0x38] sm:$0xff]  ;;  %82 = vmatpush.msra.mxu0 %v1318_v0  ;;  %v1340_v4 = vld [vmem:[%s1649_s1 + $0x30] sm:$0xff]  ;;  %v1356_v7 = vld [vmem:[%s1649_s1 + $0x28] sm:$0xff] }
   0x3   :  { %v1328_v2 = vld [vmem:[%s1649_s1 + $0x58] sm:$0xff]  ;;  %102 = vmatpush.msra.mxu1 %v1323_v1  ;;  %v1345_v5 = vld [vmem:[%s1649_s1 + $0x50] sm:$0xff]  ;;  %v1363_v8 = vld [vmem:[%s1649_s1 + $0x48] sm:$0xff] }
   0x4   :  { %122 = vmatpush.msra.mxu2 %v1328_v2  ;;  %83 = vmatpush.msra.mxu0 %v1335_v3  ;;  %v1368_v9 = vld [vmem:[%s1649_s1 + $0x78] sm:$0xff]  ;;  %v1375_v10 = vld [vmem:[%s1649_s1] sm:$0xff]  ;;  %v1385_v12 = vld [vmem:[%s1649_s1 + $0x70] sm:$0xff] }
   0x5   :  { %103 = vmatpush.msra.mxu1 %v1340_v4  ;;  %142 = vmatpush.msra.mxu3 %v1368_v9  ;;  %v1380_v11 = vld [vmem:[%s1649_s1 + $0x20] sm:$0xff]  ;;  %v1404_v15 = vld [vmem:[%s1649_s1 + $0x68] sm:$0xff] }
   0x6   :  { %123 = vmatpush.msra.mxu2 %v1345_v5  ;;  %84 = vmatpush.msra.mxu0 %v1351_v6  ;;  %v1392_v13 = vld [vmem:[%s1649_s1 + $0x40] sm:$0xff] }
   0x7   :  { %104 = vmatpush.msra.mxu1 %v1356_v7  ;;  %v53_v14 = vld [vmem:[%s1648_s0] sm:$0xff]  ;;  %143 = vmatpush.msra.mxu3 %v1385_v12 }
   0x8   :  { %124 = vmatpush.msra.mxu2 %v1363_v8  ;;  %85 = vmatpush.msra.mxu0 %v1375_v10 }
   0x9   :  { %105 = vmatpush.msra.mxu1 %v1380_v11  ;;  %1137 = vmatmul.msk.f32.vlgmr.msra.gmra.mxu0 %vm66_vm0, %v53_v14 }
   0xa   :  { %125 = vmatpush.msra.mxu2 %v1392_v13 }
   0xb   :  { %12 = vsyncpa [#allocation3], 0  ;;  %1138 = vmatmul.msk.f32.vlgmr.msra.gmra.mxu1 %vm66_vm0, %v53_v14  ;;  %1139 = vmatmul.msk.f32.vlgmr.msra.gmra.mxu2 %vm66_vm0, %v53_v14  ;;  %v1413_v16 = vld [vmem:[%s1649_s1 + $0x60] sm:$0xff]  ;;  %s1270_s14 = smov 120   ;;  %vm153_vm1 = vcmask 64512   ;;  %s1125_s17 = sshll.u32 %s1655_s7, 4  ;;  %s1126_s17 = int_to_ptr.hbm [resolvable:$true] %s1125_s17 }
   0xc   :  { %144 = vmatpush.msra.mxu3 %v1404_v15  ;;  %v1421_v17 = vld [vmem:[%s1650_s2] ss:$0 sm:$0xff]  ;;  %v1428_v20 = vld [vmem:[%s1650_s2 + $0x2] ss:$0 sm:$0xff]  ;;  %v1433_v21 = vld [vmem:[%s1650_s2 + $0x1] ss:$0 sm:$0xff] }
   0xd   :  { %v1445_v26 = vld [vmem:[%s1650_s2 + $0x3] ss:$0 sm:$0xff]  ;;  %s1271_s2 = smov 112   ;;  %s1273_s18 = smov 128  }
   0xe   :  { %145 = vmatpush.msra.mxu3 %v1413_v16  ;;  %s1274_s19 = smov 8  }
   0xf   :  { %1140 = vmatmul.msk.f32.vlgmr.msra.gmra.mxu3 %vm66_vm0, %v53_v14 }
  0x86   :  { %v87_v18 = vpop.f32.mrf.mxu0 }
  0x87   :  { %v88_v19 = vadd.f32 %v1421_v17, %v87_v18 }
  0x88   :  { %v107_v22 = vpop.f32.mrf.mxu1 }
  0x89   :  { %151 = vrot.lane.b32.xlu1 %v88_v19, %s1270_s14  ;;  %v108_v25 = vadd.f32 %v1433_v21, %v107_v22 }
  0x8b   :  { %v1196_v44 = vpack.i.bf16 %v108_v25, %v88_v19 }
  0x8e   :  { %v127_v23 = vpop.f32.mrf.mxu2 }
  0x8f   :  { %v1436_v24 = vadd.f32 %v1428_v20, %v127_v23 }
  0x91   :  { %206 = vrot.lane.b32.xlu0 %v1436_v24, %s1270_s14  ;;  %179 = vrot.lane.b32.xlu1 %v108_v25, %s1270_s14 }
  0x92   :  { %v147_v27 = vpop.f32.mrf.mxu3 }
  0x93   :  { %v1448_v28 = vadd.f32 %v1445_v26, %v147_v27 }
  0x99   :  { %233 = vrot.lane.b32.xlu0 %v1448_v28, %s1270_s14 }
  0xfb   :  { %v152_v29 = vpop.permute.xlu1 %151 }
  0xfc   :  { %1141 = vmatpush.xpose.msk.msrb.mxu0 %vm153_vm1, %v152_v29 }
  0xff   :  { %1142 = vmatmul.msk.f32.vlgmr.msrb.gmra.mxu0 %vm153_vm1, %v88_v19 }
 0x103   :  { %v207_v30 = vpop.permute.xlu0 %206  ;;  %v180_v31 = vpop.permute.xlu1 %179 }
 0x104   :  { %1145 = vmatpush.xpose.msk.msrb.mxu2 %vm153_vm1, %v207_v30  ;;  %1143 = vmatpush.xpose.msk.msrb.mxu1 %vm153_vm1, %v180_v31 }
 0x107   :  { %1146 = vmatmul.msk.f32.vlgmr.msrb.gmra.mxu2 %vm153_vm1, %v1436_v24  ;;  %1144 = vmatmul.msk.f32.vlgmr.msrb.gmra.mxu1 %vm153_vm1, %v108_v25  ;;  %v1191_v25 = vpack.i.bf16 %v1448_v28, %v1436_v24 }
 0x10b   :  { %v234_v32 = vpop.permute.xlu0 %233 }
 0x10c   :  { %1147 = vmatpush.xpose.msk.msrb.mxu3 %vm153_vm1, %v234_v32 }
 0x10f   :  { %1148 = vmatmul.msk.f32.vlgmr.msrb.gmra.mxu3 %vm153_vm1, %v1448_v28 }
 0x17c   :  { %v175_v33 = vpop.f32.mrf.mxu0 }
 0x17d   :  { %v259_v34 = vmul.f32 0.35355338, %v175_v33 }
 0x17f   :  { %v263_v35 = vsel %vm153_vm1, %v259_v34, -inf }
 0x180   :  { %264 = vmax.xlane.f32.xlu0 %v263_v35 }
 0x184   :  { %v202_v36 = vpop.f32.mrf.mxu1 }
 0x185   :  { %v260_v37 = vmul.f32 0.35355338, %v202_v36 }
 0x187   :  { %v266_v38 = vsel %vm153_vm1, %v260_v37, -inf }
 0x188   :  { %267 = vmax.xlane.f32.xlu1 %v266_v38 }
 0x18a   :  { %v229_v39 = vpop.f32.mrf.mxu2 }
 0x18b   :  { %v261_v40 = vmul.f32 0.35355338, %v229_v39 }
 0x18d   :  { %v269_v41 = vsel %vm153_vm1, %v261_v40, -inf }
 0x18e   :  { %270 = vmax.xlane.f32.xlu2 %v269_v41 }
 0x192   :  { %v256_v42 = vpop.f32.mrf.mxu3 }
 0x193   :  { %v262_v43 = vmul.f32 0.35355338, %v256_v42 }
 0x194   :  { %1197 = vrot.lane.b32.xlu0 %v1196_v44, %s1271_s2 }
 0x195   :  { %v272_v45 = vsel %vm153_vm1, %v262_v43, -inf }
 0x196   :  { %273 = vmax.xlane.f32.xlu2 %v272_v45 }
 0x1f3   :  { %v265_v46 = vpop.xlane.xlu0 %264 }
 0x1f4   :  { %v275_v47 = vsub.f32 %v259_v34, %v265_v46 }
 0x1f6   :  { %v279_v48 = vmul.f32 1.442695, %v275_v47 }
 0x1f8   :  { %1212 = vpow2.f32 %v279_v48 }
 0x1fb   :  { %v268_v49 = vpop.xlane.xlu1 %267 }
 0x1fc   :  { %v276_v50 = vsub.f32 %v260_v37, %v268_v49 }
 0x1fe   :  { %v1213_v51 = vpop.eup %1212  ;;  %v281_v52 = vmul.f32 1.442695, %v276_v50 }
 0x1ff   :  { %v287_v53 = vsel %vm153_vm1, %v1213_v51, 0.0 }
 0x200   :  { %1214 = vpow2.f32 %v281_v52  ;;  %288 = vadd.xlane.f32.xlu2 %v287_v53 }
 0x201   :  { %v271_v54 = vpop.xlane.xlu2 %270 }
 0x202   :  { %v277_v55 = vsub.f32 %v261_v40, %v271_v54 }
 0x204   :  { %v283_v56 = vmul.f32 1.442695, %v277_v55 }
 0x206   :  { %v1215_v57 = vpop.eup %1214  ;;  %1216 = vpow2.f32 %v283_v56  ;;  %v1198_v58 = vpop.permute.xlu0 %1197 }
 0x207   :  { %v1200_v59 = vunpack.i.h.bf16 %v1198_v58  ;;  %v1199_v60 = vunpack.i.l.bf16 %v1198_v58  ;;  %v290_v61 = vsel %vm153_vm1, %v1215_v57, 0.0 }
 0x208   :  { %291 = vadd.xlane.f32.xlu2 %v290_v61 }
 0x209   :  { %v274_v62 = vpop.xlane.xlu2 %273  ;;  %380 = vmatpush.msra.mxu0 %v1199_v60  ;;  %406 = vmatpush.msra.mxu1 %v1200_v59 }
 0x20a   :  { %v278_v63 = vsub.f32 %v262_v43, %v274_v62 }
 0x20c   :  { %v285_v14 = vmul.f32 1.442695, %v278_v63  ;;  %v1469_v18 = vpop.eup %1216 }
 0x20d   :  { %v293_v19 = vsel %vm153_vm1, %v1469_v18, 0.0 }
 0x20e   :  { %1218 = vpow2.f32 %v285_v14 }
 0x210   :  { %294 = vadd.xlane.f32.xlu2 %v293_v19 }
 0x214   :  { %v1473_v22 = vpop.eup %1218 }
 0x215   :  { %v296_v23 = vsel %vm153_vm1, %v1473_v22, 0.0 }
 0x218   :  { %297 = vadd.xlane.f32.xlu2 %v296_v23 }
 0x230   :  { %1192 = vrot.lane.b32.xlu2 %v1191_v25, %s1271_s2 }
 0x273   :  { %v289_v27 = vpop.xlane.xlu2 %288 }
 0x274   :  { %1220 = vrcp.f32 %v289_v27  ;;  %v310_v33 = vand.u32 2147483648, %v289_v27  ;;  %v308_v35 = vand.u32 2147483647, %v289_v27  ;;  %vm304_vm3 = vweird.f32 %v289_v27 }
 0x276   :  { %v311_v38 = vor.u32 1.1754944e-38, %v310_v33  ;;  %vm309_vm5 = vcmp.eq.f32.partialorder %v308_v35, 8.507059e+37 }
 0x27a   :  { %v1221_v29 = vpop.eup %1220 }
 0x27b   :  { %v300_v30 = vmul.f32 %v1221_v29, %v289_v27  ;;  %v292_v31 = vpop.xlane.xlu2 %291  ;;  %vm305_vm2 = vweird.f32 %v1221_v29 }
 0x27c   :  { %1222 = vrcp.f32 %v292_v31  ;;  %vm306_vm4 = vmor %vm304_vm3, %vm305_vm2  ;;  %v325_v43 = vand.u32 2147483648, %v292_v31  ;;  %v323_v45 = vand.u32 2147483647, %v292_v31  ;;  %vm319_vm7 = vweird.f32 %v292_v31 }
 0x27d   :  { %v301_v32 = vsub.f32 1.0, %v300_v30 }
 0x27e   :  { %v326_v48 = vor.u32 1.1754944e-38, %v325_v43  ;;  %vm324_vm9 = vcmp.eq.f32.partialorder %v323_v45, 8.507059e+37 }
 0x27f   :  { %v302_v34 = vmul.f32 %v1221_v29, %v301_v32 }
 0x281   :  { %v303_v36 = vadd.f32 %v1221_v29, %v302_v34 }
 0x282   :  { %v1223_v37 = vpop.eup %1222 }
 0x283   :  { %v307_v39 = vsel %vm306_vm4, %v1221_v29, %v303_v36  ;;  %v315_v24 = vmul.f32 %v1223_v37, %v292_v31  ;;  %v295_v28 = vpop.xlane.xlu2 %294  ;;  %vm320_vm6 = vweird.f32 %v1223_v37  ;;  %vm595_vm4 = vcmask 523264  }
 0x284   :  { %v312_v40 = vsel %vm309_vm5, %v311_v38, %v307_v39  ;;  %1224 = vrcp.f32 %v295_v28  ;;  %vm321_vm8 = vmor %vm319_vm7, %vm320_vm6  ;;  %v338_v58 = vand.u32 2147483647, %v295_v28  ;;  %vm334_vm11 = vweird.f32 %v295_v28 }
 0x285   :  { %v316_v41 = vsub.f32 1.0, %v315_v24  ;;  %v313_v42 = vmul.f32 %v1213_v51, %v312_v40  ;;  %v340_v51 = vand.u32 2147483648, %v295_v28 }
 0x286   :  { %vm339_vm13 = vcmp.eq.f32.partialorder %v338_v58, 8.507059e+37 }
 0x287   :  { %v317_v44 = vmul.f32 %v1223_v37, %v316_v41  ;;  %1149 = vmatmul.msk.f32.vlgmr.msra.gmra.mxu0 %vm153_vm1, %v313_v42  ;;  %v341_v61 = vor.u32 1.1754944e-38, %v340_v51 }
 0x289   :  { %v318_v46 = vadd.f32 %v1223_v37, %v317_v44 }
 0x28a   :  { %v1225_v47 = vpop.eup %1224 }
 0x28b   :  { %v322_v49 = vsel %vm321_vm8, %v1223_v37, %v318_v46  ;;  %v330_v50 = vmul.f32 %v1225_v47, %v295_v28  ;;  %v298_v52 = vpop.xlane.xlu2 %297  ;;  %vm335_vm10 = vweird.f32 %v1225_v47  ;;  %v1498_v37 = vld [vmem:[%s1651_s3 + $0x8] sm:$0xff] }
 0x28c   :  { %v327_v53 = vsel %vm324_vm9, %v326_v48, %v322_v49  ;;  %1226 = vrcp.f32 %v298_v52  ;;  %vm336_vm12 = vmor %vm334_vm11, %vm335_vm10  ;;  %v355_v29 = vand.u32 2147483648, %v298_v52  ;;  %v353_v31 = vand.u32 2147483647, %v298_v52  ;;  %484 = vmatpush.msrb.mxu0 %v1498_v37 }
 0x28d   :  { %v331_v54 = vsub.f32 1.0, %v330_v50  ;;  %v328_v55 = vmul.f32 %v1215_v57, %v327_v53  ;;  %vm349_vm15 = vweird.f32 %v298_v52 }
 0x28e   :  { %v356_v33 = vor.u32 1.1754944e-38, %v355_v29  ;;  %vm354_vm3 = vcmp.eq.f32.partialorder %v353_v31, 8.507059e+37 }
 0x28f   :  { %v332_v56 = vmul.f32 %v1225_v47, %v331_v54  ;;  %1150 = vmatmul.msk.f32.vlgmr.msra.gmra.mxu1 %vm153_vm1, %v328_v55 }
 0x291   :  { %v333_v59 = vadd.f32 %v1225_v47, %v332_v56 }
 0x292   :  { %v1227_v60 = vpop.eup %1226 }
 0x293   :  { %v337_v62 = vsel %vm336_vm12, %v1225_v47, %v333_v59  ;;  %v345_v63 = vmul.f32 %v1227_v60, %v298_v52  ;;  %v1193_v14 = vpop.permute.xlu2 %1192  ;;  %vm350_vm14 = vweird.f32 %v1227_v60 }
 0x294   :  { %v342_v19 = vsel %vm339_vm13, %v341_v61, %v337_v62  ;;  %v1195_v23 = vunpack.i.h.bf16 %v1193_v14  ;;  %v1194_v25 = vunpack.i.l.bf16 %v1193_v14  ;;  %vm351_vm2 = vmor %vm349_vm15, %vm350_vm14 }
 0x295   :  { %v346_v27 = vsub.f32 1.0, %v345_v63  ;;  %v343_v57 = vmul.f32 %v1469_v18, %v342_v19  ;;  %v1489_v18 = vld [vmem:[%s1651_s3] sm:$0xff] }
 0x296   :  { %432 = vmatpush.msra.mxu2 %v1194_v25  ;;  %458 = vmatpush.msra.mxu3 %v1195_v23 }
 0x297   :  { %v347_v30 = vmul.f32 %v1227_v60, %v346_v27  ;;  %1151 = vmatmul.msk.f32.vlgmr.msra.gmra.mxu2 %vm153_vm1, %v343_v57  ;;  %507 = vmatpush.msrb.mxu1 %v1489_v18 }
 0x299   :  { %v348_v32 = vadd.f32 %v1227_v60, %v347_v30  ;;  %614 = vmatpush.msra.mxu1 %v1318_v0  ;;  %v1514_v0 = vld [vmem:[%s1651_s3 + $0x18] sm:$0xff] }
 0x29a   :  { %558 = vmatpush.msrb.mxu3 %v1514_v0 }
 0x29b   :  { %v352_v34 = vsel %vm351_vm2, %v1227_v60, %v348_v32  ;;  %615 = vmatpush.msra.mxu1 %v1335_v3 }
 0x29c   :  { %v357_v35 = vsel %vm354_vm3, %v356_v33, %v352_v34 }
 0x29d   :  { %v358_v36 = vmul.f32 %v1473_v22, %v357_v35  ;;  %616 = vmatpush.msra.mxu1 %v1351_v6  ;;  %v1505_v22 = vld [vmem:[%s1651_s3 + $0x10] sm:$0xff] }
 0x29e   :  { %532 = vmatpush.msrb.mxu2 %v1505_v22 }
 0x29f   :  { %1152 = vmatmul.msk.f32.vlgmr.msra.gmra.mxu3 %vm153_vm1, %v358_v36  ;;  %617 = vmatpush.msra.mxu1 %v1375_v10  ;;  %v1547_v10 = vld [vmem:[%s1653_s5 + $0x8] sm:$0xff] }
 0x2a0   :  { %634 = vmatpush.msra.mxu2 %v1323_v1  ;;  %654 = vmatpush.msra.mxu3 %v1328_v2  ;;  %v1161_v1 = vld [vmem:[%s1648_s0 + $0x8] sm:$0xff] }
 0x2a2   :  { %635 = vmatpush.msra.mxu2 %v1340_v4  ;;  %655 = vmatpush.msra.mxu3 %v1345_v5  ;;  %v1535_v5 = vld [vmem:[%s1653_s5 + $0x18] sm:$0xff] }
 0x2a3   :  { %586 = vmatpush.msra.mxu0 %v1535_v5 }
 0x2a4   :  { %636 = vmatpush.msra.mxu2 %v1356_v7  ;;  %656 = vmatpush.msra.mxu3 %v1363_v8  ;;  %v1541_v8 = vld [vmem:[%s1653_s5 + $0x10] sm:$0xff] }
 0x2a5   :  { %587 = vmatpush.msra.mxu0 %v1541_v8 }
 0x2a6   :  { %637 = vmatpush.msra.mxu2 %v1380_v11  ;;  %657 = vmatpush.msra.mxu3 %v1392_v13  ;;  %v1553_v11 = vld [vmem:[%s1653_s5] sm:$0xff] }
 0x2a7   :  { %588 = vmatpush.msra.mxu0 %v1547_v10 }
 0x2a9   :  { %589 = vmatpush.msra.mxu0 %v1553_v11 }
 0x304   :  { %v382_v3 = vpop.f32.mrf.mxu0 }
 0x305   :  { %1155 = vmatmul.msk.f32.vlgmr.msrb.gmra.mxu1 %vm153_vm1, %v382_v3 }
 0x30c   :  { %v408_v4 = vpop.f32.mrf.mxu1 }
 0x30d   :  { %1154 = vmatmul.msk.f32.vlgmr.msrb.gmra.mxu0 %vm153_vm1, %v408_v4  ;;  %1162 = vmatmul.msk.f32.vlgmr.msra.gmra.mxu1 %vm66_vm0, %v1161_v1 }
 0x30e   :  { %674 = vmatpush.msrb.mxu0 %v1368_v9 }
 0x310   :  { %675 = vmatpush.msrb.mxu0 %v1385_v12 }
 0x312   :  { %676 = vmatpush.msrb.mxu0 %v1404_v15 }
 0x314   :  { %677 = vmatpush.msrb.mxu0 %v1413_v16 }
 0x31a   :  { %v434_v6 = vpop.f32.mrf.mxu2 }
 0x31b   :  { %1157 = vmatmul.msk.f32.vlgmr.msrb.gmra.mxu2 %vm153_vm1, %v434_v6 }
 0x322   :  { %v460_v2 = vpop.f32.mrf.mxu3 }
 0x323   :  { %1159 = vmatmul.msk.f32.vlgmr.msrb.gmra.mxu3 %vm153_vm1, %v460_v2  ;;  %1163 = vmatmul.msk.f32.vlgmr.msra.gmra.mxu2 %vm66_vm0, %v1161_v1 }
 0x32b   :  { %1164 = vmatmul.msk.f32.vlgmr.msra.gmra.mxu3 %vm66_vm0, %v1161_v1 }
 0x382   :  { %v509_v7 = vpop.f32.mrf.mxu1 }
 0x38a   :  { %v619_v13 = vpop.f32.mrf.mxu1  ;;  %v486_v24 = vpop.f32.mrf.mxu0 }
 0x38b   :  { %v1556_v38 = vadd.f32 %v1421_v17, %v619_v13  ;;  %v510_v28 = vadd.f32 %v509_v7, %v486_v24  ;;  %v1568_v17 = vld [vmem:[%s1652_s4] ss:$0 sm:$0xff] }
 0x38d   :  { %683 = vrot.lane.b32.xlu0 %v1556_v38, %s1270_s14 }
 0x39e   :  { %v534_v39 = vpop.f32.mrf.mxu2 }
 0x39f   :  { %v537_v40 = vadd.f32 %v534_v39, %v510_v28 }
 0x3a6   :  { %v560_v41 = vpop.f32.mrf.mxu3  ;;  %v639_v9 = vpop.f32.mrf.mxu2 }
 0x3a7   :  { %v563_v42 = vadd.f32 %v560_v41, %v537_v40  ;;  %v1571_v43 = vadd.f32 %v1433_v21, %v639_v9 }
 0x3a9   :  { %v567_v12 = vadd.f32 %v1568_v17, %v563_v42  ;;  %710 = vrot.lane.b32.xlu2 %v1571_v43, %s1270_s14 }
 0x3ab   :  { %1160 = vmatmul.msk.f32.vlgmr.msra.gmra.mxu0 %vm66_vm0, %v567_v12 }
 0x3ae   :  { %v659_v15 = vpop.f32.mrf.mxu3 }
 0x3af   :  { %v660_v16 = vadd.f32 %v1428_v20, %v659_v15  ;;  %v1590_v20 = vld [vmem:[%s1654_s6] ss:$0 sm:$0xff]  ;;  %s1272_s6 = smov [#allocation2]  }
 0x3b1   :  { %737 = vrot.lane.b32.xlu1 %v660_v16, %s1270_s14  ;;  %v1201_v33 = vpack.i.bf16 %v1556_v38, %v660_v16 }
 0x3b3   :  { %1165 = vmatmul.msk.f32.vlgmr.msrb.gmra.mxu0 %vm66_vm0, %v1161_v1 }
 0x3ff   :  { %v684_v44 = vpop.permute.xlu0 %683 }
 0x400   :  { %1166 = vmatpush.xpose.msk.msrb.mxu1 %vm153_vm1, %v684_v44 }
 0x403   :  { %1167 = vmatmul.msk.f32.vlgmr.msrb.gmra.mxu1 %vm153_vm1, %v1556_v38  ;;  %v711_v21 = vpop.permute.xlu2 %710 }
 0x404   :  { %1168 = vmatpush.xpose.msk.msrb.mxu2 %vm153_vm1, %v711_v21 }
 0x407   :  { %1169 = vmatmul.msk.f32.vlgmr.msrb.gmra.mxu2 %vm153_vm1, %v1571_v43 }
 0x423   :  { %v738_v45 = vpop.permute.xlu1 %737 }
 0x424   :  { %1170 = vmatpush.xpose.msk.msrb.mxu3 %vm153_vm1, %v738_v45 }
 0x427   :  { %1171 = vmatmul.msk.f32.vlgmr.msrb.gmra.mxu3 %vm153_vm1, %v660_v16 }
 0x428   :  { %v591_v46 = vpop.f32.mrf.mxu0 }
 0x429   :  { %v592_v47 = vadd.f32 %v1590_v20, %v591_v46 }
 0x42b   :  { %v594_v48 = vmax.f32 %v592_v47, 0.0 }
 0x42d   :  { %596 = vst.msk [vmem:[#allocation2] sm:$0xff] %vm595_vm4, %v594_v48 }
 0x430   :  { %v679_v49 = vpop.f32.mrf.mxu0 }
 0x431   :  { %v1596_v50 = vadd.f32 %v1445_v26, %v679_v49 }
 0x433   :  { %764 = vrot.lane.b32.xlu2 %v1596_v50, %s1270_s14  ;;  %s1123_s14 = sshll.u32 %s1272_s6, 4  ;;  %s1124_s14 = int_to_ptr.vmem [resolvable:$true] %s1123_s14 }
 0x480   :  { %v706_v52 = vpop.f32.mrf.mxu1 }
 0x481   :  { %v790_v53 = vmul.f32 0.35355338, %v706_v52 }
 0x483   :  { %v794_v54 = vsel %vm153_vm1, %v790_v53, -inf }
 0x484   :  { %795 = vmax.xlane.f32.xlu0 %v794_v54 }
 0x48a   :  { %v733_v55 = vpop.f32.mrf.mxu2 }
 0x48b   :  { %v791_v51 = vmul.f32 0.35355338, %v733_v55 }
 0x48d   :  { %v765_v56 = vpop.permute.xlu2 %764  ;;  %v797_v58 = vsel %vm153_vm1, %v791_v51, -inf }
 0x48e   :  { %798 = vmax.xlane.f32.xlu2 %v797_v58  ;;  %1172 = vmatpush.xpose.msk.msra.mxu0 %vm153_vm1, %v765_v56 }
 0x491   :  { %1173 = vmatmul.msk.f32.vlgmr.msra.gmra.mxu0 %vm153_vm1, %v1596_v50 }
 0x4aa   :  { %v760_v26 = vpop.f32.mrf.mxu3 }
 0x4ab   :  { %v792_v59 = vmul.f32 0.35355338, %v760_v26 }
 0x4ad   :  { %v800_v60 = vsel %vm153_vm1, %v792_v59, -inf }
 0x4ae   :  { %801 = vmax.xlane.f32.xlu1 %v800_v60 }
 0x4f7   :  { %v796_v61 = vpop.xlane.xlu0 %795 }
 0x4f8   :  { %v806_v62 = vsub.f32 %v790_v53, %v796_v61 }
 0x4fa   :  { %v810_v63 = vmul.f32 1.442695, %v806_v62 }
 0x4fc   :  { %1228 = vpow2.f32 %v810_v63 }
 0x501   :  { %v799_v23 = vpop.xlane.xlu2 %798 }
 0x502   :  { %v1229_v14 = vpop.eup %1228  ;;  %v807_v25 = vsub.f32 %v791_v51, %v799_v23 }
 0x503   :  { %v818_v19 = vsel %vm153_vm1, %v1229_v14, 0.0 }
 0x504   :  { %819 = vadd.xlane.f32.xlu2 %v818_v19  ;;  %v812_v27 = vmul.f32 1.442695, %v807_v25 }
 0x506   :  { %1230 = vpow2.f32 %v812_v27 }
 0x50c   :  { %v1608_v31 = vpop.eup %1230 }
 0x50d   :  { %v821_v32 = vsel %vm153_vm1, %v1608_v31, 0.0 }
 0x50e   :  { %v787_v57 = vpop.f32.mrf.mxu0 }
 0x50f   :  { %v793_v29 = vmul.f32 0.35355338, %v787_v57 }
 0x511   :  { %v803_v30 = vsel %vm153_vm1, %v793_v29, -inf }
 0x512   :  { %804 = vmax.xlane.f32.xlu1 %v803_v30 }
 0x51a   :  { %822 = vadd.xlane.f32.xlu1 %v821_v32 }
 0x51c   :  { %1202 = vrot.lane.b32.xlu2 %v1201_v33, %s1271_s2 }
 0x521   :  { %v802_v34 = vpop.xlane.xlu1 %801 }
 0x522   :  { %v808_v35 = vsub.f32 %v792_v59, %v802_v34 }
 0x524   :  { %v814_v36 = vmul.f32 1.442695, %v808_v35 }
 0x526   :  { %1232 = vpow2.f32 %v814_v36 }
 0x52c   :  { %v1614_v3 = vpop.eup %1232 }
 0x52d   :  { %v824_v1 = vsel %vm153_vm1, %v1614_v3, 0.0 }
 0x52e   :  { %825 = vadd.xlane.f32.xlu0 %v824_v1 }
 0x533   :  { %916 = vrot.lane.b32.xlu1 %v1571_v43, %s1271_s2 }
 0x577   :  { %v820_v4 = vpop.xlane.xlu2 %819 }
 0x578   :  { %1234 = vrcp.f32 %v820_v4  ;;  %v841_v24 = vand.u32 2147483648, %v820_v4  ;;  %v839_v40 = vand.u32 2147483647, %v820_v4  ;;  %vm835_vm6 = vweird.f32 %v820_v4 }
 0x57a   :  { %v842_v42 = vor.u32 1.1754944e-38, %v841_v24  ;;  %vm840_vm8 = vcmp.eq.f32.partialorder %v839_v40, 8.507059e+37 }
 0x57e   :  { %v1235_v6 = vpop.eup %1234 }
 0x57f   :  { %v831_v2 = vmul.f32 %v1235_v6, %v820_v4  ;;  %v1203_v7 = vpop.permute.xlu2 %1202  ;;  %vm836_vm5 = vweird.f32 %v1235_v6 }
 0x580   :  { %v1205_v13 = vunpack.i.h.bf16 %v1203_v7  ;;  %v1204_v38 = vunpack.i.l.bf16 %v1203_v7  ;;  %vm837_vm7 = vmor %vm835_vm6, %vm836_vm5 }
 0x581   :  { %v832_v39 = vsub.f32 1.0, %v831_v2 }
 0x582   :  { %911 = vmatpush.msra.mxu1 %v1205_v13  ;;  %963 = vmatpush.msra.mxu3 %v1204_v38 }
 0x583   :  { %v833_v28 = vmul.f32 %v1235_v6, %v832_v39 }
 0x584   :  { %1014 = vmatpush.msrb.mxu1 %v1498_v37  ;;  %1061 = vmatpush.msrb.mxu3 %v1505_v22 }
 0x585   :  { %v834_v41 = vadd.f32 %v1235_v6, %v833_v28  ;;  %v805_v9 = vpop.xlane.xlu1 %804 }
 0x586   :  { %v809_v43 = vsub.f32 %v793_v29, %v805_v9 }
 0x587   :  { %v838_v12 = vsel %vm837_vm7, %v1235_v6, %v834_v41 }
 0x588   :  { %v843_v15 = vsel %vm840_vm8, %v842_v42, %v838_v12  ;;  %v816_v16 = vmul.f32 1.442695, %v809_v43 }
 0x589   :  { %v844_v44 = vmul.f32 %v1229_v14, %v843_v15 }
 0x58a   :  { %1236 = vpow2.f32 %v816_v16 }
 0x58b   :  { %1174 = vmatmul.msk.f32.vlgmr.msra.gmra.mxu1 %vm153_vm1, %v844_v44 }
 0x58c   :  { %1108 = vmatpush.msra.mxu1 %v1535_v5 }
 0x58d   :  { %v823_v21 = vpop.xlane.xlu1 %822 }
 0x58e   :  { %1238 = vrcp.f32 %v823_v21  ;;  %1109 = vmatpush.msra.mxu1 %v1541_v8  ;;  %v856_v52 = vand.u32 2147483648, %v823_v21  ;;  %vm850_vm10 = vweird.f32 %v823_v21  ;;  %v854_v5 = vand.u32 2147483647, %v823_v21 }
 0x590   :  { %v1237_v37 = vpop.eup %1236  ;;  %1110 = vmatpush.msra.mxu1 %v1547_v10  ;;  %v857_v8 = vor.u32 1.1754944e-38, %v856_v52  ;;  %vm855_vm12 = vcmp.eq.f32.partialorder %v854_v5, 8.507059e+37 }
 0x591   :  { %v827_v22 = vsel %vm153_vm1, %v1237_v37, 0.0 }
 0x592   :  { %828 = vadd.xlane.f32.xlu0 %v827_v22  ;;  %1111 = vmatpush.msra.mxu1 %v1553_v11 }
 0x594   :  { %v1239_v45 = vpop.eup %1238 }
 0x595   :  { %v846_v46 = vmul.f32 %v1239_v45, %v823_v21  ;;  %vm851_vm9 = vweird.f32 %v1239_v45 }
 0x596   :  { %vm852_vm11 = vmor %vm850_vm10, %vm851_vm9 }
 0x597   :  { %v847_v47 = vsub.f32 1.0, %v846_v46 }
 0x599   :  { %v848_v48 = vmul.f32 %v1239_v45, %v847_v47 }
 0x59b   :  { %v849_v49 = vadd.f32 %v1239_v45, %v848_v48 }
 0x59d   :  { %v853_v53 = vsel %vm852_vm11, %v1239_v45, %v849_v49 }
 0x59e   :  { %v858_v10 = vsel %vm855_vm12, %v857_v8, %v853_v53 }
 0x59f   :  { %v859_v51 = vmul.f32 %v1608_v31, %v858_v10 }
 0x5a1   :  { %v826_v54 = vpop.xlane.xlu0 %825 }
 0x5a2   :  { %1240 = vrcp.f32 %v826_v54  ;;  %v871_v26 = vand.u32 2147483648, %v826_v54  ;;  %v869_v60 = vand.u32 2147483647, %v826_v54  ;;  %vm865_vm14 = vweird.f32 %v826_v54 }
 0x5a4   :  { %v872_v62 = vor.u32 1.1754944e-38, %v871_v26  ;;  %vm870_vm2 = vcmp.eq.f32.partialorder %v869_v60, 8.507059e+37 }
 0x5a5   :  { %v917_v55 = vpop.permute.xlu1 %916 }
 0x5a6   :  { %968 = vrot.lane.b32.xlu0 %v1596_v50, %s1271_s2  ;;  %937 = vmatpush.msra.mxu2 %v917_v55 }
 0x5a7   :  { %1175 = vmatmul.msk.f32.vlgmr.msra.gmra.mxu2 %vm153_vm1, %v859_v51 }
 0x5a8   :  { %v1241_v11 = vpop.eup %1240  ;;  %1037 = vmatpush.msrb.mxu2 %v1489_v18 }
 0x5a9   :  { %v861_v56 = vmul.f32 %v1241_v11, %v826_v54  ;;  %vm866_vm13 = vweird.f32 %v1241_v11 }
 0x5aa   :  { %vm867_vm15 = vmor %vm865_vm14, %vm866_vm13 }
 0x5ab   :  { %v862_v58 = vsub.f32 1.0, %v861_v56 }
 0x5ad   :  { %v863_v59 = vmul.f32 %v1241_v11, %v862_v58 }
 0x5af   :  { %v864_v61 = vadd.f32 %v1241_v11, %v863_v59 }
 0x5b1   :  { %v868_v63 = vsel %vm867_vm15, %v1241_v11, %v864_v61 }
 0x5b2   :  { %v873_v14 = vsel %vm870_vm2, %v872_v62, %v868_v63 }
 0x5b3   :  { %v874_v50 = vmul.f32 %v1614_v3, %v873_v14 }
 0x5b5   :  { %1176 = vmatmul.msk.f32.vlgmr.msra.gmra.mxu3 %vm153_vm1, %v874_v50 }
 0x605   :  { %v829_v19 = vpop.xlane.xlu0 %828 }
 0x606   :  { %1242 = vrcp.f32 %v829_v19  ;;  %v886_v57 = vand.u32 2147483648, %v829_v19  ;;  %v884_v30 = vand.u32 2147483647, %v829_v19  ;;  %vm880_vm5 = vweird.f32 %v829_v19 }
 0x608   :  { %v913_v18 = vpop.f32.mrf.mxu1  ;;  %v887_v32 = vor.u32 1.1754944e-38, %v886_v57  ;;  %vm885_vm7 = vcmp.eq.f32.partialorder %v884_v30, 8.507059e+37 }
 0x609   :  { %1180 = vmatmul.msk.f32.vlgmr.msrb.gmra.mxu2 %vm153_vm1, %v913_v18 }
 0x60c   :  { %v1243_v23 = vpop.eup %1242 }
 0x60d   :  { %v876_v25 = vmul.f32 %v1243_v23, %v829_v19  ;;  %vm881_vm3 = vweird.f32 %v1243_v23 }
 0x60e   :  { %vm882_vm6 = vmor %vm880_vm5, %vm881_vm3 }
 0x60f   :  { %v877_v27 = vsub.f32 1.0, %v876_v25 }
 0x611   :  { %v878_v29 = vmul.f32 %v1243_v23, %v877_v27 }
 0x613   :  { %v879_v31 = vadd.f32 %v1243_v23, %v878_v29 }
 0x615   :  { %v883_v33 = vsel %vm882_vm6, %v1243_v23, %v879_v31 }
 0x616   :  { %v888_v34 = vsel %vm885_vm7, %v887_v32, %v883_v33 }
 0x617   :  { %v889_v35 = vmul.f32 %v1237_v37, %v888_v34 }
 0x618   :  { %v969_v36 = vpop.permute.xlu0 %968 }
 0x619   :  { %989 = vmatpush.msrb.mxu0 %v969_v36 }
 0x61a   :  { %1177 = vmatmul.msk.f32.vlgmr.msrb.gmra.mxu0 %vm153_vm1, %v889_v35 }
 0x61b   :  { %1086 = vmatpush.msra.mxu0 %v1514_v0 }
 0x62a   :  { %v939_v3 = vpop.f32.mrf.mxu2 }
 0x62b   :  { %1179 = vmatmul.msk.f32.vlgmr.msrb.gmra.mxu1 %vm153_vm1, %v939_v3 }
 0x638   :  { %v965_v1 = vpop.f32.mrf.mxu3 }
 0x639   :  { %1182 = vmatmul.msk.f32.vlgmr.msrb.gmra.mxu3 %vm153_vm1, %v965_v1 }
 0x68c   :  { %v1039_v2 = vpop.f32.mrf.mxu2 }
 0x697   :  { %v991_v4 = vpop.f32.mrf.mxu0 }
 0x698   :  { %1184 = vmatmul.msk.f32.vlgmr.msra.gmra.mxu0 %vm153_vm1, %v991_v4 }
 0x6a8   :  { %v1016_v6 = vpop.f32.mrf.mxu1 }
 0x6a9   :  { %v1040_v13 = vadd.f32 %v1039_v2, %v1016_v6 }
 0x6bc   :  { %v1063_v7 = vpop.f32.mrf.mxu3 }
 0x6bd   :  { %v1066_v38 = vadd.f32 %v1063_v7, %v1040_v13 }
 0x715   :  { %v1088_v39 = vpop.f32.mrf.mxu0 }
 0x716   :  { %v1091_v24 = vadd.f32 %v1088_v39, %v1066_v38 }
 0x718   :  { %v1092_v28 = vadd.f32 %v1568_v17, %v1091_v24 }
 0x71a   :  { %1185 = vmatmul.msk.f32.vlgmr.msra.gmra.mxu1 %vm66_vm0, %v1092_v28 }
 0x797   :  { %v1113_v0 = vpop.f32.mrf.mxu1 }
 0x798   :  { %v1114_v40 = vadd.f32 %v1590_v20, %v1113_v0 }
 0x79a   :  { %v1116_v41 = vmax.f32 %v1114_v40, 0.0 }
 0x79c   :  { %1118 = vst.msk [vmem:[#allocation2 + $0x8] sm:$0xff] %vm595_vm4, %v1116_v41 }
 0x79d   :  { %1131 = dma.vmem_to_hbm [thread:$0]  %s1124_s14, 256, %s1126_s17, [#allocation3], %s1273_s18, %s1273_s18, %s1274_s19  }
 0x79e   :  { %1268 = dma.done.wait [#allocation3], 256  }
 0x79f   :  { %1269 = vsyncadd [#allocation3], 4294967040 }
 0x7a0   :  { %1136 = vsyncpa [#allocation3], 1 }

</bundles_post_ra>
